<compile_context>
chip_gen: v6e
topology: v6e:2x2x1
jax: 0.10.0
libtpu: 0.0.40
codegen_flags: <defaults>
</compile_context>

<pallas_src>
import math

import jax
import jax.numpy as jnp
from jax import lax
from jax.experimental import pallas as pl
from jax.experimental.pallas import tpu as pltpu

TEMP = 0.1
_INV_SQRT_TEMP = 1.0 / math.sqrt(TEMP)


def _round_up(v: int, m: int) -> int:
    return ((v + m - 1) // m) * m


# ---------------------------------------------------------------------------
# Kernel 1: one-pass row L2 normalization + 1/sqrt(TEMP) fold + dtype cast.
# ---------------------------------------------------------------------------
def _normalize_kernel(x_ref, o_ref):
    x = x_ref[...].astype(jnp.float32)
    ssq = jnp.sum(x * x, axis=-1, keepdims=True)
    # Matches F.normalize / the reference: x / max(||x||_2, 1e-12).
    inv = _INV_SQRT_TEMP / jnp.maximum(jnp.sqrt(ssq), 1e-12)
    o_ref[...] = (x * inv).astype(o_ref.dtype)


def _l2_normalize_scaled(x, out_dtype):
    """(Bp, Dp) -> (Bp, Dp): row-normalize, scale by 1/sqrt(TEMP), cast.

    All-zero (padded) rows map to exactly-zero rows (load-bearing invariant).
    """
    Bp, Dp = x.shape
    per_row = Dp * (x.dtype.itemsize + jnp.dtype(out_dtype).itemsize) * 2  # dbl-buffered
    tile = 512
    while tile > 128 and (Bp % tile != 0 or tile * per_row > (12 << 20)):
        tile //= 2
    vmem_limit = int(min(max(2 * tile * per_row, 32 << 20), 56 << 20))
    return pl.pallas_call(
        _normalize_kernel,
        out_shape=jax.ShapeDtypeStruct((Bp, Dp), out_dtype),
        grid=(Bp // tile,),
        in_specs=[pl.BlockSpec((tile, Dp), lambda i: (i, 0))],
        out_specs=pl.BlockSpec((tile, Dp), lambda i: (i, 0)),
        compiler_params=pltpu.CompilerParams(
            dimension_semantics=("parallel",),
            vmem_limit_bytes=vmem_limit),
    )(x)


# ---------------------------------------------------------------------------
# Kernel 2: streaming ConLoss row-sweep with online log-sum-exp.
# ---------------------------------------------------------------------------
def _make_conloss_kernel(tm, tn, n_valid, Bp, n_col_tiles, exact):
    has_pad = Bp != n_valid
    pad_from = n_valid // tn          # first column tile containing padded columns
    dot_kwargs = dict(preferred_element_type=jnp.float32)
    if exact:
        dot_kwargs["precision"] = lax.Precision.HIGHEST

    def kernel(xr_ref, xc_ref, labr_ref, labc_ref, pos_ref,
               m_ref, l_ref, s_ref, c_ref):
        i = pl.program_id(0)          # row tile   ("parallel")
        k = pl.program_id(1)          # column tile ("arbitrary" reduction)

        @pl.when(k == 0)
        def _init():
            # m starts at 0 (not -inf): valid because the zeroed diagonal makes
            # every real row's true max >= 0 and padded-column sims are exactly 0.
            m_ref[...] = jnp.zeros_like(m_ref)
            l_ref[...] = jnp.zeros_like(l_ref)
            s_ref[...] = jnp.zeros_like(s_ref)
            c_ref[...] = jnp.zeros_like(c_ref)

        # (TM, TN) similarity tile on the MXU, f32 accumulation.  1/TEMP is
        # already folded into the normalized inputs.
        sim = lax.dot_general(xr_ref[...], xc_ref[...],
                              dimension_numbers=(((1,), (1,)), ((), ())),
                              **dot_kwargs)

        # Branch-free diagonal zeroing:
        #   global row == global col  <=>  (local_r - local_c) == k*TN - i*TM.
        rmc = (lax.broadcasted_iota(jnp.int32, (tm, tn), 0)
               - lax.broadcasted_iota(jnp.int32, (tm, tn), 1))
        sim = jnp.where(rmc == (k * tn - i * tm), 0.0, sim)

        lab_eq = labr_ref[...] == labc_ref[...]           # (TM, TN) bool

        def accumulate(col_ok):
            # col_ok: None (all columns valid) or (1, TN) f32 validity mask.
            maskf = lab_eq.astype(jnp.float32)
            if col_ok is not None:
                maskf = maskf * col_ok
            # The diagonal is NOT excluded here: sim's diagonal is zero so it
            # adds 0 to S, and its +1 in C is removed exactly at finalize.
            s_ref[...] += jnp.sum(maskf * sim, axis=1, keepdims=True)
            c_ref[...] += jnp.sum(maskf, axis=1, keepdims=True)
            # Online log-sum-exp (exp stays in f32: v5e's EUP has no bf16 path).
            m_prev = m_ref[...]
            m_new = jnp.maximum(m_prev, jnp.max(sim, axis=1, keepdims=True))
            e = jnp.exp(sim - m_new)
            if col_ok is not None:
                e = e * col_ok
            l_ref[...] = (jnp.exp(m_prev - m_new) * l_ref[...]
                          + jnp.sum(e, axis=1, keepdims=True))
            m_ref[...] = m_new
            # NOTE: the axis=1 reductions could be offloaded to the MXU
            # (tile @ ones) if the XLU becomes the binding unit on v7x.

        if not has_pad:
            accumulate(None)                    # zero masking overhead
        else:
            # Padded columns live only in tiles k >= pad_from (possibly more
            # than one tile when TM > TN); everything before runs unmasked.
            @pl.when(k < pad_from)
            def _():
                accumulate(None)

            @pl.when(k >= pad_from)
            def _():
                col_ok = ((k * tn + lax.broadcasted_iota(jnp.int32, (1, tn), 1))
                          < n_valid).astype(jnp.float32)
                accumulate(col_ok)

        @pl.when(k == n_col_tiles - 1)
        def _finalize():
            cnt = c_ref[...] - 1.0              # remove the diagonal from C
            denom = jnp.maximum(cnt, 1.0)
            logsum = jnp.log(l_ref[...] + 1e-12)
            # sum_j mask*(sim - m) - C*log(sum exp + 1e-12), over max(C, 1).
            pos_ref[...] = (s_ref[...] - cnt * (m_ref[...] + logsum)) / denom

    return kernel


def _pick_tiles(B, Dp, tm_req, tn_req, dtype_bytes):
    b128 = _round_up(B, 128)
    tm = max(128, min(_round_up(tm_req, 128), b128))
    tn = max(128, min(_round_up(tn_req, 128), b128))
    # Keep one tile a multiple of the other so Bp = round_up(B, lcm) stays small.
    if tm >= tn:
        tm = max(tn, (tm // tn) * tn)
    else:
        tn = max(tm, (tn // tm) * tm)
    # VMEM cap (v7x: 64 MiB/TC): double-buffered row+col input blocks <= ~24 MiB.
    while 2 * (tm + tn) * Dp * dtype_bytes > (24 << 20) and max(tm, tn) > 128:
        if tm >= tn and tm > 128:
            tm = max(128, tm // 2)
        else:
            tn = max(128, tn // 2)
    return tm, tn


def conloss(output, targets, *, tm=512, tn=256,
            matmul_dtype=jnp.bfloat16, col_buffers=None):
    """ConLoss forward.  output: (B, D) float array, targets: (B,) int labels.

    tm / tn: row / column tiles of the implicit B x B similarity matrix
      (multiples of 128, clamped to the batch and a ~24 MiB VMEM block budget).
      Large tm minimizes column re-streaming; tn >= 256 fills v6e/v7x's MXUs.
    matmul_dtype: bf16 (full-rate MXU, ~1% loss error) or f32 (HIGHEST-precision
      MXU passes, matches the reference to ~1e-5).
    col_buffers: optional pipeline depth (pl.Buffered) for the column stream.
    """
    B, D = output.shape
    Dp = _round_up(D, 128)                       # lane-dense contraction dim
    dtype_bytes = jnp.dtype(matmul_dtype).itemsize
    tm, tn = _pick_tiles(B, Dp, tm, tn, dtype_bytes)
    Bp = _round_up(B, tm * tn // math.gcd(tm, tn))
    g_row, g_col = Bp // tm, Bp // tn
    # NOTE(v7x): with 2 TensorCores, keep g_row >= 2 (ideally even) when the
    # batch allows so the "parallel" row axis shards across both cores.

    x = output
    if (Bp, Dp) != (B, D):
        x = jnp.pad(x, ((0, Bp - B), (0, Dp - D)))   # zero padding is load-bearing
    xn = _l2_normalize_scaled(x, matmul_dtype)       # one pass over x

    lab = targets.astype(jnp.int32)
    if Bp != B:
        # Pad value irrelevant: padded columns are excluded by the validity
        # mask and padded rows are dropped in the epilogue.
        lab = jnp.pad(lab, (0, Bp - B), constant_values=-1)
    lab_rows = lab.reshape(Bp, 1)
    lab_cols = lab.reshape(1, Bp)

    exact = jnp.dtype(matmul_dtype) == jnp.dtype(jnp.float32)
    kernel = _make_conloss_kernel(tm, tn, B, Bp, g_col, exact)

    col_kwargs = {}
    if col_buffers is not None:
        col_kwargs["pipeline_mode"] = pl.Buffered(col_buffers)

    vmem_need = (2 * (tm + tn) * Dp * dtype_bytes    # double-buffered x blocks
                 + 2 * (tm + tn) * 4                 # label blocks
                 + 2 * tm * 4 + 4 * tm * 4)          # output block + f32 stats
    vmem_limit = int(min(max(2 * vmem_need, 32 << 20), 56 << 20))

    pos = pl.pallas_call(
        kernel,
        out_shape=jax.ShapeDtypeStruct((Bp, 1), jnp.float32),
        grid=(g_row, g_col),
        in_specs=[
            pl.BlockSpec((tm, Dp), lambda i, k: (i, 0)),               # row tile (cached over k)
            pl.BlockSpec((tn, Dp), lambda i, k: (k, 0), **col_kwargs),  # col stream
            pl.BlockSpec((tm, 1), lambda i, k: (i, 0)),                # row labels
            pl.BlockSpec((1, tn), lambda i, k: (0, k)),                # col labels
        ],
        # (TM, 1) output written once per row sweep under pl.when -> off the
        # hot path; lane-dense reshaping deliberately skipped.
        out_specs=pl.BlockSpec((tm, 1), lambda i, k: (i, 0)),
        scratch_shapes=[
            pltpu.VMEM((tm, 1), jnp.float32),   # running max   m
            pltpu.VMEM((tm, 1), jnp.float32),   # running l = sum exp(sim - m)
            pltpu.VMEM((tm, 1), jnp.float32),   # running S = sum(mask * sim)
            pltpu.VMEM((tm, 1), jnp.float32),   # running C = sum(mask)
        ],
        compiler_params=pltpu.CompilerParams(
            dimension_semantics=("parallel", "arbitrary"),
            vmem_limit_bytes=vmem_limit),
    )(xn, xn, lab_rows, lab_cols)

    # Tiny O(B) epilogue: drop padded rows, average over the real batch, negate.
    return -jnp.mean(pos[:B, 0])


def conloss_ref(output, targets):
    """Pure-JAX reference mirroring the PyTorch module, for validation."""
    x = output.astype(jnp.float32)
    xn = x / jnp.maximum(jnp.linalg.norm(x, axis=-1, keepdims=True), 1e-12)
    B = x.shape[0]
    sim = jnp.einsum("bd,cd->bc", xn, xn,
                     precision=jax.lax.Precision.HIGHEST) / TEMP
    sim = sim - jnp.diag(jnp.diag(sim))
    logits = sim - jnp.max(sim, axis=1, keepdims=True)
    exp_logits = jnp.exp(logits)
    lab = targets.reshape(-1, 1)
    mask = (lab == lab.T) & ~jnp.eye(B, dtype=bool)
    mask = mask.astype(jnp.float32)
    log_prob = logits * mask - jnp.log(jnp.sum(exp_logits, axis=1, keepdims=True) + 1e-12)
    mask_sum = jnp.sum(mask, axis=1)
    mask_sum = jnp.where(mask_sum == 0, 1.0, mask_sum)
    pos = jnp.sum(mask * log_prob, axis=1) / mask_sum
    return -jnp.mean(pos)


if __name__ == "__main__":
    key = jax.random.PRNGKey(0)
    k1, k2, k3, k4 = jax.random.split(key, 4)

    # Case 1: tiny single-tile case matching the module's toy shapes.
    B1, D1, C1 = 8, 32, 3
    out1 = jax.random.normal(k1, (B1, D1), dtype=jnp.float32)
    tgt1 = jax.random.randint(k2, (B1,), 0, C1, dtype=jnp.int32)
    ref1 = conloss_ref(out1, tgt1)

    got1 = conloss(out1, tgt1, matmul_dtype=jnp.float32)     # exact MXU path
    jax.block_until_ready(got1)
    assert jnp.allclose(got1, ref1, rtol=1e-3, atol=1e-3), (got1, ref1)

    got1b = conloss(out1, tgt1)                              # default bf16 path
    jax.block_until_ready(got1b)
    assert jnp.allclose(got1b, ref1, rtol=5e-2, atol=5e-2), (got1b, ref1)

    # Case 2: multi-tile, TM != TN, padding spanning multiple trailing column
    # tiles, online reduction across column tiles, diagonal in off-(i==k) tiles.
    B2, D2, C2 = 300, 48, 7
    out2 = jax.random.normal(k3, (B2, D2), dtype=jnp.float32)
    tgt2 = jax.random.randint(k4, (B2,), 0, C2, dtype=jnp.int32)
    ref2 = conloss_ref(out2, tgt2)

    got2 = conloss(out2, tgt2, tm=256, tn=128, matmul_dtype=jnp.float32)
    jax.block_until_ready(got2)
    assert jnp.allclose(got2, ref2, rtol=1e-3, atol=1e-3), (got2, ref2)

    print("KERNEL_OK")
</pallas_src>

<mosaic_0001>
module attributes {stable_mosaic.version = 11 : i64} {
  func.func @_normalize_kernel(%arg0: i32, %arg1: memref<128x128xf32, #tpu.memory_space<vmem>>, %arg2: memref<128x128xf32, #tpu.memory_space<vmem>>) attributes {dimension_semantics = [#tpu.dimension_semantics<parallel>], iteration_bounds = array<i64: 1>, scalar_prefetch = 0 : i64, scratch_operands = 0 : i64, tpu.core_type = #tpu.core_type<tc>, window_params = [{transform_indices = @transform_0, window_bounds = array<i64: 128, 128>}, {transform_indices = @transform_1, window_bounds = array<i64: 128, 128>}]} {
    %c0 = arith.constant 0 : index
    %c0_0 = arith.constant 0 : index
    %0 = vector.load %arg1[%c0, %c0_0] : memref<128x128xf32, #tpu.memory_space<vmem>>, vector<128x128xf32>
    %1 = arith.mulf %0, %0 : vector<128x128xf32>
    %cst = arith.constant dense<0.000000e+00> : vector<128xf32>
    %2 = vector.multi_reduction <add>, %1, %cst [1] : vector<128x128xf32> to vector<128xf32>
    %3 = vector.shape_cast %2 : vector<128xf32> to vector<128x1xf32>
    %4 = math.sqrt %3 : vector<128x1xf32>
    %cst_1 = arith.constant 9.99999996E-13 : f32
    %5 = vector.broadcast %cst_1 : f32 to vector<128x1xf32>
    %6 = arith.maximumf %4, %5 : vector<128x1xf32>
    %cst_2 = arith.constant 3.1622777 : f32
    %7 = vector.broadcast %cst_2 : f32 to vector<128x1xf32>
    %8 = arith.divf %7, %6 : vector<128x1xf32>
    %9 = vector.broadcast %8 : vector<128x1xf32> to vector<128x128xf32>
    %10 = arith.mulf %0, %9 : vector<128x128xf32>
    %c0_3 = arith.constant 0 : index
    %c0_4 = arith.constant 0 : index
    %11 = vector.load %arg2[%c0_3, %c0_4] : memref<128x128xf32, #tpu.memory_space<vmem>>, vector<128x128xf32>
    tpu.vector_store %arg2[%c0_3, %c0_4], %10 {strides = array<i32>} : memref<128x128xf32, #tpu.memory_space<vmem>>, vector<128x128xf32>,
    return
  }
  func.func @transform_0(%arg0: i32) -> (i32, i32) {
    %c0_i32 = arith.constant 0 : i32
    %c0_i32_0 = arith.constant 0 : i32
    return %arg0, %c0_i32 : i32, i32
  }
  func.func @transform_1(%arg0: i32) -> (i32, i32) {
    %c0_i32 = arith.constant 0 : i32
    %c0_i32_0 = arith.constant 0 : i32
    return %arg0, %c0_i32 : i32, i32
  }
}

</mosaic_0001>

<bundles_post_ra>
// kernel: tpu_custom_call.1
= control target key start
LH: loop header
LB: loop body
LE: loop exit
PB: predicated region body
PF: predicated region fallthrough
CT: control target
= control target key end

     0   :  { %6 = vsyncpa [#allocation3], 0  ;;  %s632_s0 = inlined_call_operand.hbm [shape: f32[128,128], index: 0, kind: input, shape index: {}]   ;;  %s633_s1 = inlined_call_operand.hbm [shape: f32[128,128], index: 1, kind: output, shape index: {}]  }
   0x1   :  { %7 = vsyncpa [#allocation4], 0  ;;  %s408_s6 = smov [#allocation2]  }
   0x2   :  { %s13_s7 = sshll.u32 %s408_s6, 4  ;;  %s14_s7 = int_to_ptr.vmem [resolvable:$true] %s13_s7 }
   0x3   :  { %s372_s8 = scalar_lea.vmem %s14_s7, 2048  ;;  %p377_p1 = scmp.lt.s32.totalorder %s14_s7, %s14_s7 }
   0x4   :  { %p373_p0 = scmp.ne.s32.totalorder %s14_s7, %s372_s8  ;;  %p378_p2 = scmp.lt.s32.totalorder %s372_s8, %s372_s8 }
   0x6   :  { %p379_p3 = por %p378_p2, %p377_p1 }
   0x8   :  { %p380_p4 = pnand %p379_p3, %p373_p0 }
   0xa   :  { %383 = shalt.err (!%p380_p4)
}
   0xb   :  { %s409_s9 = smov 128   ;;  %s410_s10 = smov 8  }
   0xc   :  { %19 = dma.hbm_to_vmem [thread:$0]  %s632_s0, 2048, %s14_s7, [#allocation3], %s409_s9, %s409_s9, %s410_s10  }
   0xd   :  { %404 = dma.done.wait [#allocation3], 2048  }
   0xe   :  { %405 = vsyncadd [#allocation3], 4294965248  ;;  %v428_v0 = vld [vmem:[#allocation2 + $0x10] sm:$0xff]  ;;  %v430_v1 = vld [vmem:[#allocation2] sm:$0xff]  ;;  %s411_s0 = smov [#allocation5]  }
   0xf   :  { %v432_v2 = vld [vmem:[#allocation2 + $0x18] sm:$0xff]  ;;  %v41_v3 = vmul.f32 %v428_v0, %v428_v0  ;;  %v39_v4 = vmul.f32 %v430_v1, %v430_v1  ;;  %v438_v5 = vld [vmem:[#allocation2 + $0x8] sm:$0xff]  ;;  %v446_v9 = vld [vmem:[#allocation2 + $0x20] sm:$0xff]  ;;  %s284_s13 = sshll.u32 %s411_s0, 4  ;;  %s285_s13 = int_to_ptr.vmem [resolvable:$true] %s284_s13 }
  0x10   :  { %v42_v6 = vmul.f32 %v432_v2, %v432_v2  ;;  %v40_v7 = vmul.f32 %v438_v5, %v438_v5  ;;  %v444_v8 = vld [vmem:[#allocation2 + $0x28] sm:$0xff]  ;;  %v43_v11 = vmul.f32 %v446_v9, %v446_v9  ;;  %v452_v12 = vld [vmem:[#allocation2 + $0x38] sm:$0xff]  ;;  %v454_v13 = vld [vmem:[#allocation2 + $0x30] sm:$0xff]  ;;  %s384_s14 = scalar_lea.vmem %s285_s13, 2048  ;;  %p389_p6 = scmp.lt.s32.totalorder %s285_s13, %s285_s13 }
  0x11   :  { %59 = vadd.xlane.f32.xlu1 %v41_v3  ;;  %55 = vadd.xlane.f32.xlu0 %v39_v4  ;;  %v44_v10 = vmul.f32 %v444_v8, %v444_v8  ;;  %v46_v14 = vmul.f32 %v452_v12, %v452_v12  ;;  %v45_v15 = vmul.f32 %v454_v13, %v454_v13  ;;  %v460_v16 = vld [vmem:[#allocation2 + $0x48] sm:$0xff]  ;;  %v462_v17 = vld [vmem:[#allocation2 + $0x40] sm:$0xff]  ;;  %v468_v20 = vld [vmem:[#allocation2 + $0x58] sm:$0xff]  ;;  %p385_p5 = scmp.ne.s32.totalorder %s285_s13, %s384_s14  ;;  %p390_p7 = scmp.lt.s32.totalorder %s384_s14, %s384_s14 }
  0x12   :  { %v48_v18 = vmul.f32 %v460_v16, %v460_v16  ;;  %v47_v19 = vmul.f32 %v462_v17, %v462_v17  ;;  %v470_v21 = vld [vmem:[#allocation2 + $0x50] sm:$0xff]  ;;  %v50_v22 = vmul.f32 %v468_v20, %v468_v20  ;;  %v476_v24 = vld [vmem:[#allocation2 + $0x68] sm:$0xff]  ;;  %v478_v25 = vld [vmem:[#allocation2 + $0x60] sm:$0xff] }
  0x13   :  { %v49_v23 = vmul.f32 %v470_v21, %v470_v21  ;;  %v52_v26 = vmul.f32 %v476_v24, %v476_v24  ;;  %v51_v27 = vmul.f32 %v478_v25, %v478_v25  ;;  %v484_v28 = vld [vmem:[#allocation2 + $0x78] sm:$0xff]  ;;  %v486_v29 = vld [vmem:[#allocation2 + $0x70] sm:$0xff]  ;;  %p391_p8 = por %p390_p7, %p389_p6 }
  0x14   :  { %v54_v30 = vmul.f32 %v484_v28, %v484_v28  ;;  %v53_v31 = vmul.f32 %v486_v29, %v486_v29 }
  0x15   :  { %61 = vadd.xlane.f32.xlu1 %v42_v6  ;;  %57 = vadd.xlane.f32.xlu0 %v40_v7  ;;  %p392_p9 = pnand %p391_p8, %p385_p5 }
  0x19   :  { %65 = vadd.xlane.f32.xlu1 %v44_v10  ;;  %63 = vadd.xlane.f32.xlu0 %v43_v11 }
  0x1d   :  { %69 = vadd.xlane.f32.xlu1 %v46_v14  ;;  %67 = vadd.xlane.f32.xlu0 %v45_v15 }
  0x21   :  { %73 = vadd.xlane.f32.xlu1 %v48_v18  ;;  %71 = vadd.xlane.f32.xlu0 %v47_v19 }
  0x25   :  { %77 = vadd.xlane.f32.xlu1 %v50_v22  ;;  %75 = vadd.xlane.f32.xlu0 %v49_v23 }
  0x29   :  { %81 = vadd.xlane.f32.xlu1 %v52_v26  ;;  %79 = vadd.xlane.f32.xlu0 %v51_v27 }
  0x2d   :  { %85 = vadd.xlane.f32.xlu1 %v54_v30  ;;  %83 = vadd.xlane.f32.xlu0 %v53_v31 }
  0x9a   :  { %v60_v32 = vpop.xlane.xlu1 %59  ;;  %v56_v33 = vpop.xlane.xlu0 %55 }
  0x9b   :  { %300 = vrsqrt.f32 %v60_v32  ;;  %vm103_vm0 = vcmp.eq.f32.partialorder %v60_v32, inf  ;;  %vm105_vm1 = vcmp.eq.f32.partialorder %v60_v32, 0.0  ;;  %v106_v43 = vand.u32 2147483648, %v60_v32 }
  0x9c   :  { %302 = vrsqrt.f32 %v56_v33  ;;  %vm89_vm2 = vcmp.eq.f32.partialorder %v56_v33, inf  ;;  %vm91_vm3 = vcmp.eq.f32.partialorder %v56_v33, 0.0  ;;  %v92_v45 = vand.u32 2147483648, %v56_v33 }
  0x9e   :  { %v62_v34 = vpop.xlane.xlu1 %61  ;;  %v58_v35 = vpop.xlane.xlu0 %57 }
  0x9f   :  { %304 = vrsqrt.f32 %v62_v34  ;;  %vm110_vm4 = vcmp.eq.f32.partialorder %v62_v34, inf  ;;  %vm112_vm5 = vcmp.eq.f32.partialorder %v62_v34, 0.0  ;;  %v113_v49 = vand.u32 2147483648, %v62_v34 }
  0xa0   :  { %306 = vrsqrt.f32 %v58_v35  ;;  %vm96_vm6 = vcmp.eq.f32.partialorder %v58_v35, inf  ;;  %vm98_vm7 = vcmp.eq.f32.partialorder %v58_v35, 0.0  ;;  %v99_v57 = vand.u32 2147483648, %v58_v35 }
  0xa2   :  { %v492_v36 = vpop.xlane.xlu1 %65  ;;  %v494_v37 = vpop.xlane.xlu0 %63 }
  0xa3   :  { %308 = vrsqrt.f32 %v492_v36  ;;  %vm124_vm8 = vcmp.eq.f32.partialorder %v492_v36, inf  ;;  %vm126_vm9 = vcmp.eq.f32.partialorder %v492_v36, 0.0  ;;  %v127_v63 = vand.u32 2147483648, %v492_v36 }
  0xa4   :  { %310 = vrsqrt.f32 %v494_v37  ;;  %vm117_vm10 = vcmp.eq.f32.partialorder %v494_v37, inf  ;;  %vm119_vm11 = vcmp.eq.f32.partialorder %v494_v37, 0.0  ;;  %v120_v19 = vand.u32 2147483648, %v494_v37 }
  0xa6   :  { %v498_v38 = vpop.xlane.xlu1 %69  ;;  %v500_v39 = vpop.xlane.xlu0 %67 }
  0xa7   :  { %312 = vrsqrt.f32 %v498_v38  ;;  %vm138_vm12 = vcmp.eq.f32.partialorder %v498_v38, inf  ;;  %vm140_vm13 = vcmp.eq.f32.partialorder %v498_v38, 0.0  ;;  %v141_v31 = vand.u32 2147483648, %v498_v38 }
  0xa8   :  { %v301_v40 = vpop.eup %300  ;;  %314 = vrsqrt.f32 %v500_v39  ;;  %vm131_vm14 = vcmp.eq.f32.partialorder %v500_v39, inf  ;;  %vm133_vm15 = vcmp.eq.f32.partialorder %v500_v39, 0.0 }
  0xa9   :  { %v303_v41 = vpop.eup %302  ;;  %v102_v42 = vmul.f32 %v301_v40, %v60_v32 }
  0xaa   :  { %v88_v44 = vmul.f32 %v303_v41, %v56_v33  ;;  %v504_v46 = vpop.xlane.xlu1 %73  ;;  %v506_v47 = vpop.xlane.xlu0 %71 }
  0xab   :  { %v104_v48 = vsel %vm103_vm0, %v60_v32, %v102_v42  ;;  %316 = vrsqrt.f32 %v504_v46  ;;  %vm152_vm0 = vcmp.eq.f32.partialorder %v504_v46, inf }
  0xac   :  { %v305_v50 = vpop.eup %304  ;;  %v107_v51 = vsel %vm105_vm1, %v106_v43, %v104_v48  ;;  %v90_v52 = vsel %vm89_vm2, %v56_v33, %v88_v44  ;;  %318 = vrsqrt.f32 %v506_v47  ;;  %v134_v43 = vand.u32 2147483648, %v500_v39 }
  0xad   :  { %v307_v53 = vpop.eup %306  ;;  %v201_v54 = vmax.f32 %v107_v51, 1e-12  ;;  %v93_v55 = vsel %vm91_vm3, %v92_v45, %v90_v52  ;;  %v109_v56 = vmul.f32 %v305_v50, %v62_v34  ;;  %vm154_vm1 = vcmp.eq.f32.partialorder %v504_v46, 0.0 }
  0xae   :  { %v199_v58 = vmax.f32 %v93_v55, 1e-12  ;;  %v95_v59 = vmul.f32 %v307_v53, %v58_v35  ;;  %v514_v60 = vpop.xlane.xlu1 %77  ;;  %v516_v61 = vpop.xlane.xlu0 %75  ;;  %vm145_vm2 = vcmp.eq.f32.partialorder %v506_v47, inf  ;;  %vm147_vm3 = vcmp.eq.f32.partialorder %v506_v47, 0.0 }
  0xaf   :  { %320 = vrcp.f32 %v201_v54  ;;  %v111_v62 = vsel %vm110_vm4, %v62_v34, %v109_v56  ;;  %v155_v54 = vand.u32 2147483648, %v504_v46  ;;  %v148_v56 = vand.u32 2147483648, %v506_v47 }
  0xb0   :  { %v309_v3 = vpop.eup %308  ;;  %322 = vrcp.f32 %v199_v58  ;;  %v114_v4 = vsel %vm112_vm5, %v113_v49, %v111_v62  ;;  %v97_v6 = vsel %vm96_vm6, %v58_v35, %v95_v59  ;;  %vm166_vm4 = vcmp.eq.f32.partialorder %v514_v60, inf }
  0xb1   :  { %v311_v7 = vpop.eup %310  ;;  %v202_v10 = vmax.f32 %v114_v4, 1e-12  ;;  %v100_v11 = vsel %vm98_vm7, %v99_v57, %v97_v6  ;;  %v123_v14 = vmul.f32 %v309_v3, %v492_v36  ;;  %324 = vrsqrt.f32 %v514_v60 }
  0xb2   :  { %v200_v15 = vmax.f32 %v100_v11, 1e-12  ;;  %v116_v18 = vmul.f32 %v311_v7, %v494_v37  ;;  %326 = vrsqrt.f32 %v516_v61  ;;  %v530_v22 = vpop.xlane.xlu1 %81  ;;  %v543_v32 = vpop.xlane.xlu0 %79  ;;  %vm168_vm5 = vcmp.eq.f32.partialorder %v514_v60, 0.0 }
  0xb3   :  { %328 = vrcp.f32 %v202_v10  ;;  %v125_v23 = vsel %vm124_vm8, %v492_v36, %v123_v14  ;;  %vm159_vm6 = vcmp.eq.f32.partialorder %v516_v61, inf  ;;  %vm161_vm7 = vcmp.eq.f32.partialorder %v516_v61, 0.0 }
  0xb4   :  { %v313_v26 = vpop.eup %312  ;;  %330 = vrcp.f32 %v200_v15  ;;  %v128_v27 = vsel %vm126_vm9, %v127_v63, %v125_v23  ;;  %v118_v30 = vsel %vm117_vm10, %v494_v37, %v116_v18  ;;  %v169_v18 = vand.u32 2147483648, %v514_v60 }
  0xb5   :  { %v315_v33 = vpop.eup %314  ;;  %v204_v34 = vmax.f32 %v128_v27, 1e-12  ;;  %v121_v35 = vsel %vm119_vm11, %v120_v19, %v118_v30  ;;  %v137_v40 = vmul.f32 %v313_v26, %v498_v38  ;;  %332 = vrsqrt.f32 %v530_v22 }
  0xb6   :  { %v203_v41 = vmax.f32 %v121_v35, 1e-12  ;;  %v130_v36 = vmul.f32 %v315_v33, %v500_v39  ;;  %v557_v37 = vpop.xlane.xlu1 %85  ;;  %vm180_vm8 = vcmp.eq.f32.partialorder %v530_v22, inf  ;;  %vm182_vm9 = vcmp.eq.f32.partialorder %v530_v22, 0.0 }
  0xb7   :  { %334 = vrcp.f32 %v204_v34  ;;  %v139_v42 = vsel %vm138_vm12, %v498_v38, %v137_v40  ;;  %v568_v38 = vpop.xlane.xlu0 %83  ;;  %vm173_vm10 = vcmp.eq.f32.partialorder %v543_v32, inf  ;;  %vm175_vm11 = vcmp.eq.f32.partialorder %v543_v32, 0.0 }
  0xb8   :  { %v317_v44 = vpop.eup %316  ;;  %336 = vrcp.f32 %v203_v41  ;;  %v142_v45 = vsel %vm140_vm13, %v141_v31, %v139_v42  ;;  %v132_v48 = vsel %vm131_vm14, %v500_v39, %v130_v36  ;;  %vm194_vm12 = vcmp.eq.f32.partialorder %v557_v37, inf }
  0xb9   :  { %v319_v49 = vpop.eup %318  ;;  %v206_v50 = vmax.f32 %v142_v45, 1e-12  ;;  %v135_v51 = vsel %vm133_vm15, %v134_v43, %v132_v48  ;;  %v151_v52 = vmul.f32 %v317_v44, %v504_v46  ;;  %338 = vrsqrt.f32 %v543_v32 }
  0xba   :  { %v205_v53 = vmax.f32 %v135_v51, 1e-12  ;;  %v144_v55 = vmul.f32 %v319_v49, %v506_v47  ;;  %340 = vrsqrt.f32 %v557_v37  ;;  %v183_v43 = vand.u32 2147483648, %v530_v22 }
  0xbb   :  { %342 = vrcp.f32 %v206_v50  ;;  %v153_v39 = vsel %vm152_vm0, %v504_v46, %v151_v52  ;;  %vm196_vm13 = vcmp.eq.f32.partialorder %v557_v37, 0.0  ;;  %vm187_vm14 = vcmp.eq.f32.partialorder %v568_v38, inf }
  0xbc   :  { %v321_v57 = vpop.eup %320  ;;  %344 = vrcp.f32 %v205_v53  ;;  %v156_v58 = vsel %vm154_vm1, %v155_v54, %v153_v39  ;;  %v146_v59 = vsel %vm145_vm2, %v506_v47, %v144_v55  ;;  %vm189_vm15 = vcmp.eq.f32.partialorder %v568_v38, 0.0 }
  0xbd   :  { %v323_v62 = vpop.eup %322  ;;  %v220_v63 = vmul.f32 3.1622777, %v321_v57  ;;  %v208_v3 = vmax.f32 %v156_v58, 1e-12  ;;  %v149_v4 = vsel %vm147_vm3, %v148_v56, %v146_v59  ;;  %346 = vrsqrt.f32 %v568_v38 }
  0xbe   :  { %v325_v6 = vpop.eup %324  ;;  %v216_v7 = vmul.f32 3.1622777, %v323_v62  ;;  %v207_v10 = vmax.f32 %v149_v4, 1e-12  ;;  %v197_v57 = vand.u32 2147483648, %v557_v37 }
  0xbf   :  { %v327_v11 = vpop.eup %326  ;;  %v249_v14 = vmul.f32 %v220_v63, %v428_v0  ;;  %348 = vrcp.f32 %v208_v3  ;;  %v165_v46 = vmul.f32 %v325_v6, %v514_v60  ;;  %v162_v0 = vand.u32 2147483648, %v516_v61 }
  0xc0   :  { %v329_v47 = vpop.eup %328  ;;  %v247_v15 = vmul.f32 %v216_v7, %v430_v1  ;;  %350 = vrcp.f32 %v207_v10  ;;  %v158_v19 = vmul.f32 %v327_v11, %v516_v61  ;;  %v190_v11 = vand.u32 2147483648, %v568_v38 }
  0xc1   :  { %v331_v23 = vpop.eup %330  ;;  %265 = vst [vmem:[#allocation5 + $0x10] sm:$0xff] %v249_v14  ;;  %v222_v26 = vmul.f32 3.1622777, %v329_v47  ;;  %v167_v27 = vsel %vm166_vm4, %v514_v60, %v165_v46 }
  0xc2   :  { %v333_v30 = vpop.eup %332  ;;  %263 = vst [vmem:[#allocation5] sm:$0xff] %v247_v15  ;;  %v218_v31 = vmul.f32 3.1622777, %v331_v23  ;;  %v170_v33 = vsel %vm168_vm5, %v169_v18, %v167_v27  ;;  %v160_v1 = vsel %vm159_vm6, %v516_v61, %v158_v19 }
  0xc3   :  { %v250_v34 = vmul.f32 %v222_v26, %v432_v2  ;;  %v210_v35 = vmax.f32 %v170_v33, 1e-12  ;;  %v163_v40 = vsel %vm161_vm7, %v162_v0, %v160_v1  ;;  %v179_v41 = vmul.f32 %v333_v30, %v530_v22 }
  0xc4   :  { %v335_v36 = vpop.eup %334  ;;  %v248_v60 = vmul.f32 %v218_v31, %v438_v5  ;;  %v209_v42 = vmax.f32 %v163_v40, 1e-12 }
  0xc5   :  { %v337_v44 = vpop.eup %336  ;;  %266 = vst [vmem:[#allocation5 + $0x18] sm:$0xff] %v250_v34  ;;  %v226_v45 = vmul.f32 3.1622777, %v335_v36  ;;  %352 = vrcp.f32 %v210_v35  ;;  %v181_v61 = vsel %vm180_vm8, %v530_v22, %v179_v41  ;;  %v176_v22 = vand.u32 2147483648, %v543_v32 }
  0xc6   :  { %v339_v2 = vpop.eup %338  ;;  %264 = vst [vmem:[#allocation5 + $0x8] sm:$0xff] %v248_v60  ;;  %v224_v48 = vmul.f32 3.1622777, %v337_v44  ;;  %354 = vrcp.f32 %v209_v42  ;;  %v184_v49 = vsel %vm182_vm9, %v183_v43, %v181_v61 }
  0xc7   :  { %v341_v5 = vpop.eup %340  ;;  %v252_v50 = vmul.f32 %v226_v45, %v444_v8  ;;  %v212_v51 = vmax.f32 %v184_v49, 1e-12  ;;  %v172_v52 = vmul.f32 %v339_v2, %v543_v32 }
  0xc8   :  { %v343_v53 = vpop.eup %342  ;;  %v251_v54 = vmul.f32 %v224_v48, %v446_v9  ;;  %v193_v55 = vmul.f32 %v341_v5, %v557_v37 }
  0xc9   :  { %v345_v39 = vpop.eup %344  ;;  %268 = vst [vmem:[#allocation5 + $0x28] sm:$0xff] %v252_v50  ;;  %v230_v56 = vmul.f32 3.1622777, %v343_v53  ;;  %356 = vrcp.f32 %v212_v51  ;;  %v174_v8 = vsel %vm173_vm10, %v543_v32, %v172_v52 }
  0xca   :  { %v347_v58 = vpop.eup %346  ;;  %267 = vst [vmem:[#allocation5 + $0x20] sm:$0xff] %v251_v54  ;;  %v228_v59 = vmul.f32 3.1622777, %v345_v39  ;;  %v177_v62 = vsel %vm175_vm11, %v176_v22, %v174_v8  ;;  %v195_v9 = vsel %vm194_vm12, %v557_v37, %v193_v55 }
  0xcb   :  { %v254_v63 = vmul.f32 %v230_v56, %v452_v12  ;;  %v211_v3 = vmax.f32 %v177_v62, 1e-12  ;;  %v198_v4 = vsel %vm196_vm13, %v197_v57, %v195_v9  ;;  %v186_v6 = vmul.f32 %v347_v58, %v568_v38 }
  0xcc   :  { %v349_v7 = vpop.eup %348  ;;  %v253_v10 = vmul.f32 %v228_v59, %v454_v13  ;;  %v214_v32 = vmax.f32 %v198_v4, 1e-12 }
  0xcd   :  { %v351_v14 = vpop.eup %350  ;;  %270 = vst [vmem:[#allocation5 + $0x38] sm:$0xff] %v254_v63  ;;  %v234_v46 = vmul.f32 3.1622777, %v349_v7  ;;  %358 = vrcp.f32 %v211_v3  ;;  %v188_v37 = vsel %vm187_vm14, %v568_v38, %v186_v6 }
  0xce   :  { %269 = vst [vmem:[#allocation5 + $0x30] sm:$0xff] %v253_v10  ;;  %v232_v12 = vmul.f32 3.1622777, %v351_v14  ;;  %360 = vrcp.f32 %v214_v32  ;;  %v191_v47 = vsel %vm189_vm15, %v190_v11, %v188_v37 }
  0xcf   :  { %v256_v15 = vmul.f32 %v234_v46, %v460_v16  ;;  %v213_v13 = vmax.f32 %v191_v47, 1e-12 }
  0xd0   :  { %v255_v18 = vmul.f32 %v232_v12, %v462_v17 }
  0xd1   :  { %272 = vst [vmem:[#allocation5 + $0x48] sm:$0xff] %v256_v15  ;;  %362 = vrcp.f32 %v213_v13 }
  0xd2   :  { %v353_v19 = vpop.eup %352  ;;  %271 = vst [vmem:[#allocation5 + $0x40] sm:$0xff] %v255_v18 }
  0xd3   :  { %v355_v23 = vpop.eup %354  ;;  %v238_v26 = vmul.f32 3.1622777, %v353_v19 }
  0xd4   :  { %v236_v27 = vmul.f32 3.1622777, %v355_v23 }
  0xd5   :  { %v258_v0 = vmul.f32 %v238_v26, %v468_v20 }
  0xd6   :  { %v357_v30 = vpop.eup %356  ;;  %v257_v38 = vmul.f32 %v236_v27, %v470_v21 }
  0xd7   :  { %274 = vst [vmem:[#allocation5 + $0x58] sm:$0xff] %v258_v0  ;;  %v242_v31 = vmul.f32 3.1622777, %v357_v30 }
  0xd8   :  { %273 = vst [vmem:[#allocation5 + $0x50] sm:$0xff] %v257_v38 }
  0xd9   :  { %v260_v16 = vmul.f32 %v242_v31, %v476_v24 }
  0xda   :  { %v359_v33 = vpop.eup %358 }
  0xdb   :  { %v361_v1 = vpop.eup %360  ;;  %276 = vst [vmem:[#allocation5 + $0x68] sm:$0xff] %v260_v16  ;;  %v240_v17 = vmul.f32 3.1622777, %v359_v33 }
  0xdc   :  { %v246_v34 = vmul.f32 3.1622777, %v361_v1 }
  0xdd   :  { %v259_v35 = vmul.f32 %v240_v17, %v478_v25 }
  0xde   :  { %v363_v40 = vpop.eup %362  ;;  %v262_v41 = vmul.f32 %v246_v34, %v484_v28 }
  0xdf   :  { %275 = vst [vmem:[#allocation5 + $0x60] sm:$0xff] %v259_v35  ;;  %v244_v20 = vmul.f32 3.1622777, %v363_v40 }
  0xe0   :  { %278 = vst [vmem:[#allocation5 + $0x78] sm:$0xff] %v262_v41 }
  0xe1   :  { %v261_v21 = vmul.f32 %v244_v20, %v486_v29 }
  0xe3   :  { %277 = vst [vmem:[#allocation5 + $0x70] sm:$0xff] %v261_v21 }
  0xe4   :  { %395 = shalt.err (!%p392_p9)
}
  0xe5   :  { %290 = dma.vmem_to_hbm [thread:$0]  %s285_s13, 2048, %s633_s1, [#allocation4], %s409_s9, %s409_s9, %s410_s10  }
  0xe6   :  { %406 = dma.done.wait [#allocation4], 2048  }
  0xe7   :  { %407 = vsyncadd [#allocation4], 4294965248 }
  0xe8   :  { %294 = vsyncpa [#allocation3], 1 }
  0xe9   :  { %295 = vsyncpa [#allocation4], 1 }

</bundles_post_ra>
